<compile_context>
chip_gen: v7x
topology: tpu7x:2x2x1
jax: 0.10.0
libtpu: 0.0.40
codegen_flags: <defaults>
</compile_context>

<pallas_src>
import jax
import jax.numpy as jnp
import numpy as np
from jax.experimental import pallas as pl
from jax.experimental.pallas import tpu as pltpu


def detect_kernel(x_ref, w_ref, coef_ref, g_ref, raw_ref, dec_ref):
    # 1x1 conv == (C, cin) @ (cin, TILE_S) on the MXU, f32 accumulation.
    v = jnp.dot(w_ref[...], x_ref[...], preferred_element_type=jnp.float32)
    v = v + coef_ref[:, 0:1]                       # conv bias
    raw_ref[...] = v                               # torch's x[i] (pre-sigmoid)

    s = jax.nn.sigmoid(v)                          # EUP
    quad = coef_ref[:, 1:2]
    lin = coef_ref[:, 2:3]
    cst = coef_ref[:, 3:4]
    mx = coef_ref[:, 4:5]
    my = coef_ref[:, 5:6]
    gx = g_ref[0:1, :]
    gy = g_ref[1:2, :]
    # decoded = quad*s^2 + lin*s + cst + maskx*gx + masky*gy   (Horner form)
    #   xy rows: 2*stride*s + (grid - 0.5)*stride
    #   wh rows: 4*anchor*s^2
    #   rest   : s
    dec_ref[...] = (quad * s + lin) * s + cst + mx * gx + my * gy


def _pick_tile_s(S, cin, C, vmem_budget=24 * 1024 * 1024):
    """Largest lane tile (full S, or a multiple of 128 dividing S) whose
    double-buffered VMEM footprint fits the budget."""
    def footprint(t):
        x_b = cin * t * 2                  # bf16 input block
        out_b = 2 * C * t * 4              # two f32 output blocks
        g_b = 2 * t * 4                    # grid coords block
        fixed = C * cin * 2 + C * 8 * 4    # weight + coef (resident)
        return 2 * (x_b + out_b + g_b + fixed)   # x2 for double buffering

    if S % 128 != 0:
        return S                           # small level: single full block
    cands = [S] + [t for t in (4096, 2048, 1024, 512, 256, 128)
                   if t < S and S % t == 0]
    for t in cands:
        if footprint(t) <= vmem_budget:
            return t
    return 128


def detect_level(x_nchw, w, b, anchors_i, stride_i, na, no):
    bs, cin, ny, nx = x_nchw.shape
    C = na * no
    S = ny * nx
    tile_s = _pick_tile_s(S, cin, C)
    n_s = pl.cdiv(S, tile_s)

    # Native NCHW layout (no transpose); bf16 for the MXU / halved HBM read.
    x3 = x_nchw.reshape(bs, cin, S).astype(jnp.bfloat16)
    wb = w.astype(jnp.bfloat16)                                   # (C, cin)

    # Packed per-channel decode coefficients; channel c = a*no + o.
    o_idx = jnp.arange(C) % no
    a_idx = jnp.arange(C) // no
    is_x = o_idx == 0
    is_y = o_idx == 1
    is_xy = is_x | is_y
    is_wh = (o_idx == 2) | (o_idx == 3)
    anchor_c = anchors_i[a_idx, jnp.clip(o_idx - 2, 0, 1)]
    coef = jnp.stack([
        b,                                                        # bias
        jnp.where(is_wh, 4.0 * anchor_c, 0.0),                    # quad
        jnp.where(is_xy, 2.0 * stride_i,
                  jnp.where(is_wh, 0.0, 1.0)),                    # lin
        jnp.where(is_xy, -0.5 * stride_i, 0.0),                   # cst
        jnp.where(is_x, stride_i, 0.0),                           # maskx
        jnp.where(is_y, stride_i, 0.0),                           # masky
        jnp.zeros((C,)), jnp.zeros((C,)),                         # pad to 8
    ], axis=1).astype(jnp.float32)                                # (C, 8)

    # Per-pixel grid coordinates (the _make_grid equivalent), shared over batch.
    sp = jnp.arange(S, dtype=jnp.int32)
    g = jnp.stack([(sp % nx).astype(jnp.float32),
                   (sp // nx).astype(jnp.float32)], axis=0)       # (2, S)

    cost = pl.CostEstimate(
        flops=2 * bs * S * cin * C,
        transcendentals=bs * S * C,
        bytes_accessed=2 * bs * S * cin + 2 * C * cin + 2 * 4 * bs * S * C,
    )

    raw, dec = pl.pallas_call(
        detect_kernel,
        out_shape=(jax.ShapeDtypeStruct((bs, C, S), jnp.float32),
                   jax.ShapeDtypeStruct((bs, C, S), jnp.float32)),
        grid=(bs, n_s),
        in_specs=[
            pl.BlockSpec((None, cin, tile_s), lambda bi, si: (bi, 0, si)),
            pl.BlockSpec((C, cin), lambda bi, si: (0, 0)),    # VMEM-resident
            pl.BlockSpec((C, 8), lambda bi, si: (0, 0)),      # VMEM-resident
            pl.BlockSpec((2, tile_s), lambda bi, si: (0, si)),
        ],
        out_specs=(
            pl.BlockSpec((None, C, tile_s), lambda bi, si: (bi, 0, si)),
            pl.BlockSpec((None, C, tile_s), lambda bi, si: (bi, 0, si)),
        ),
        compiler_params=pltpu.CompilerParams(
            dimension_semantics=("parallel", "parallel"),
            vmem_limit_bytes=32 * 1024 * 1024,
        ),
        cost_estimate=cost,
    )(x3, wb, coef, g)

    # (bs, C, S) is exactly torch's NCHW conv output; the remaining views are
    # the module's own glue: view(bs,na,no,ny,nx).permute(0,1,3,4,2).
    raw5 = raw.reshape(bs, na, no, ny, nx).transpose(0, 1, 3, 4, 2)
    dec5 = dec.reshape(bs, na, no, ny, nx).transpose(0, 1, 3, 4, 2)
    z = dec5.reshape(bs, na * S, no)
    return raw5, z


class DetectPallas:
    """Inference-mode Detect head."""

    def __init__(self, nc, anchors, ch, strides, key):
        self.nc = nc
        self.no = nc + 5
        self.nl = len(anchors)
        self.na = len(anchors[0]) // 2
        self.anchors = jnp.asarray(anchors, jnp.float32).reshape(self.nl, self.na, 2)
        self.stride_list = [float(s) for s in strides]
        C = self.no * self.na
        self.weights, self.biases = [], []
        for cin in ch:
            key, k1, k2 = jax.random.split(key, 3)
            # conv weight stored as (C, cin) == torch weight[:, :, 0, 0]
            self.weights.append(jax.random.normal(k1, (C, cin), jnp.float32) * 0.1)
            self.biases.append(jax.random.normal(k2, (C,), jnp.float32) * 0.1)

    def __call__(self, xs):
        x_out, z = [], []
        for i in range(self.nl):
            raw5, zi = detect_level(xs[i], self.weights[i], self.biases[i],
                                    self.anchors[i], self.stride_list[i],
                                    self.na, self.no)
            x_out.append(raw5)
            z.append(zi)
        return jnp.concatenate(z, axis=1), x_out
        # TODO(synk): torch's self.training branch (return x only) is a trivial
        # subset; only the inference decode path is implemented here.


def reference(xs, model):
    """Pure-JAX reference mirroring the torch forward (with the same bf16
    input rounding the kernel uses for the MXU) for validation."""
    zs, xouts = [], []
    for i in range(model.nl):
        bs, cin, ny, nx = xs[i].shape
        xb = xs[i].astype(jnp.bfloat16).astype(jnp.float32)
        wb = model.weights[i].astype(jnp.bfloat16).astype(jnp.float32)
        v = jnp.einsum("bchw,oc->bohw", xb, wb, precision=jax.lax.Precision.HIGHEST)
        v = v + model.biases[i][None, :, None, None]
        v = v.reshape(bs, model.na, model.no, ny, nx).transpose(0, 1, 3, 4, 2)
        xouts.append(v)
        s = jax.nn.sigmoid(v)
        yv, xv = jnp.meshgrid(jnp.arange(ny), jnp.arange(nx), indexing="ij")
        grid = jnp.stack([xv, yv], -1).reshape(1, 1, ny, nx, 2).astype(jnp.float32)
        xy = (s[..., 0:2] * 2.0 - 0.5 + grid) * model.stride_list[i]
        wh = (s[..., 2:4] * 2.0) ** 2 * model.anchors[i].reshape(1, model.na, 1, 1, 2)
        y = jnp.concatenate([xy, wh, s[..., 4:]], -1)
        zs.append(y.reshape(bs, -1, model.no))
    return jnp.concatenate(zs, 1), xouts


if __name__ == "__main__":
    key = jax.random.PRNGKey(0)

    nc = 3                      # small class count -> no = 8, C = na*no = 24
    anchors = ((10, 13, 16, 30, 33, 23),
               (30, 61, 62, 45, 59, 119),
               (116, 90, 156, 198, 373, 326))
    ch = (8, 16, 32)
    strides = (4.0, 8.0, 16.0)
    spatial = ((32, 32), (16, 16), (8, 8))
    bs = 2

    key, kparam = jax.random.split(key)
    model = DetectPallas(nc, anchors, ch, strides, kparam)

    xs = []
    for i, cin in enumerate(ch):
        key, kx = jax.random.split(key)
        ny, nx = spatial[i]
        xs.append(jax.random.normal(kx, (bs, cin, ny, nx), jnp.float32))

    z, xouts = model(xs)
    jax.block_until_ready(z)
    for xo in xouts:
        jax.block_until_ready(xo)

    # sanity vs pure-JAX reference
    z_ref, xouts_ref = reference(xs, model)
    assert z.shape == (bs, sum(model.na * ny * nx for (ny, nx) in spatial), model.no)
    np.testing.assert_allclose(np.asarray(z), np.asarray(z_ref), rtol=2e-3, atol=2e-3)
    for a, r in zip(xouts, xouts_ref):
        assert a.shape == r.shape
        np.testing.assert_allclose(np.asarray(a), np.asarray(r), rtol=2e-3, atol=2e-3)

    print("KERNEL_OK")
</pallas_src>

<mosaic_0001>
module attributes {stable_mosaic.version = 11 : i64} {
  func.func @detect_kernel(%arg0: i32, %arg1: i32, %arg2: memref<1x8x1024xbf16, #tpu.memory_space<vmem>>, %arg3: memref<24x8xbf16, #tpu.memory_space<vmem>>, %arg4: memref<24x8xf32, #tpu.memory_space<vmem>>, %arg5: memref<2x1024xf32, #tpu.memory_space<vmem>>, %arg6: memref<1x24x1024xf32, #tpu.memory_space<vmem>>, %arg7: memref<1x24x1024xf32, #tpu.memory_space<vmem>>) attributes {dimension_semantics = [#tpu.dimension_semantics<parallel>, #tpu.dimension_semantics<parallel>], iteration_bounds = array<i64: 2, 1>, scalar_prefetch = 0 : i64, scratch_operands = 0 : i64, tpu.core_type = #tpu.core_type<tc>, window_params = [{transform_indices = @transform_0, window_bounds = array<i64: 1, 8, 1024>}, {pipeline_mode = #tpu.pipeline_mode<synchronous>, transform_indices = @transform_1, window_bounds = array<i64: 24, 8>}, {pipeline_mode = #tpu.pipeline_mode<synchronous>, transform_indices = @transform_2, window_bounds = array<i64: 24, 8>}, {transform_indices = @transform_3, window_bounds = array<i64: 2, 1024>}, {transform_indices = @transform_4, window_bounds = array<i64: 1, 24, 1024>}, {transform_indices = @transform_5, window_bounds = array<i64: 1, 24, 1024>}]} {
    %c0 = arith.constant 0 : index
    %c0_0 = arith.constant 0 : index
    %0 = vector.load %arg3[%c0, %c0_0] : memref<24x8xbf16, #tpu.memory_space<vmem>>, vector<24x8xbf16>
    %c0_1 = arith.constant 0 : index
    %c0_2 = arith.constant 0 : index
    %c0_3 = arith.constant 0 : index
    %1 = vector.load %arg2[%c0_1, %c0_2, %c0_3] : memref<1x8x1024xbf16, #tpu.memory_space<vmem>>, vector<1x8x1024xbf16>
    %2 = vector.shape_cast %1 : vector<1x8x1024xbf16> to vector<8x1024xbf16>
    %cst = arith.constant dense<0.000000e+00> : vector<24x1024xf32>
    %3 = tpu.matmul %0, %2, %cst {dimension_numbers = #tpu.dot_dimension_numbers<[1], [0], [0], [1], [0, 0, 1, 1], [], []>} : vector<24x8xbf16>, vector<8x1024xbf16>, vector<24x1024xf32> -> vector<24x1024xf32>
    %c0_4 = arith.constant 0 : index
    %c0_5 = arith.constant 0 : index
    %4 = vector.load %arg4[%c0_4, %c0_5] : memref<24x8xf32, #tpu.memory_space<vmem>>, vector<24x1xf32>
    %5 = vector.broadcast %4 : vector<24x1xf32> to vector<24x1024xf32>
    %6 = arith.addf %3, %5 : vector<24x1024xf32>
    %c0_6 = arith.constant 0 : index
    %c0_7 = arith.constant 0 : index
    %c0_8 = arith.constant 0 : index
    %7 = vector.load %arg6[%c0_6, %c0_7, %c0_8] : memref<1x24x1024xf32, #tpu.memory_space<vmem>>, vector<1x24x1024xf32>
    %8 = vector.shape_cast %7 : vector<1x24x1024xf32> to vector<24x1024xf32>
    %9 = vector.shape_cast %6 : vector<24x1024xf32> to vector<1x24x1024xf32>
    tpu.vector_store %arg6[%c0_6, %c0_7, %c0_8], %9 {strides = array<i32>} : memref<1x24x1024xf32, #tpu.memory_space<vmem>>, vector<1x24x1024xf32>,
    %10 = arith.negf %6 : vector<24x1024xf32>
    %11 = math.exp %10 : vector<24x1024xf32>
    %cst_9 = arith.constant 1.000000e+00 : f32
    %12 = vector.broadcast %cst_9 : f32 to vector<24x1024xf32>
    %13 = arith.addf %12, %11 : vector<24x1024xf32>
    %14 = arith.divf %12, %13 : vector<24x1024xf32>
    %c0_10 = arith.constant 0 : index
    %c1 = arith.constant 1 : index
    %15 = vector.load %arg4[%c0_10, %c1] : memref<24x8xf32, #tpu.memory_space<vmem>>, vector<24x1xf32>
    %c0_11 = arith.constant 0 : index
    %c2 = arith.constant 2 : index
    %16 = vector.load %arg4[%c0_11, %c2] : memref<24x8xf32, #tpu.memory_space<vmem>>, vector<24x1xf32>
    %c0_12 = arith.constant 0 : index
    %c3 = arith.constant 3 : index
    %17 = vector.load %arg4[%c0_12, %c3] : memref<24x8xf32, #tpu.memory_space<vmem>>, vector<24x1xf32>
    %c0_13 = arith.constant 0 : index
    %c4 = arith.constant 4 : index
    %18 = vector.load %arg4[%c0_13, %c4] : memref<24x8xf32, #tpu.memory_space<vmem>>, vector<24x1xf32>
    %c0_14 = arith.constant 0 : index
    %c5 = arith.constant 5 : index
    %19 = vector.load %arg4[%c0_14, %c5] : memref<24x8xf32, #tpu.memory_space<vmem>>, vector<24x1xf32>
    %c0_15 = arith.constant 0 : index
    %c0_16 = arith.constant 0 : index
    %20 = vector.load %arg5[%c0_15, %c0_16] : memref<2x1024xf32, #tpu.memory_space<vmem>>, vector<1x1024xf32>
    %c1_17 = arith.constant 1 : index
    %c0_18 = arith.constant 0 : index
    %21 = vector.load %arg5[%c1_17, %c0_18] : memref<2x1024xf32, #tpu.memory_space<vmem>>, vector<1x1024xf32>
    %22 = vector.broadcast %15 : vector<24x1xf32> to vector<24x1024xf32>
    %23 = arith.mulf %22, %14 : vector<24x1024xf32>
    %24 = vector.broadcast %16 : vector<24x1xf32> to vector<24x1024xf32>
    %25 = arith.addf %23, %24 : vector<24x1024xf32>
    %26 = arith.mulf %25, %14 : vector<24x1024xf32>
    %27 = vector.broadcast %17 : vector<24x1xf32> to vector<24x1024xf32>
    %28 = arith.addf %26, %27 : vector<24x1024xf32>
    %29 = vector.broadcast %18 : vector<24x1xf32> to vector<24x1024xf32>
    %30 = vector.broadcast %20 : vector<1x1024xf32> to vector<24x1024xf32>
    %31 = arith.mulf %29, %30 : vector<24x1024xf32>
    %32 = arith.addf %28, %31 : vector<24x1024xf32>
    %33 = vector.broadcast %19 : vector<24x1xf32> to vector<24x1024xf32>
    %34 = vector.broadcast %21 : vector<1x1024xf32> to vector<24x1024xf32>
    %35 = arith.mulf %33, %34 : vector<24x1024xf32>
    %36 = arith.addf %32, %35 : vector<24x1024xf32>
    %c0_19 = arith.constant 0 : index
    %c0_20 = arith.constant 0 : index
    %c0_21 = arith.constant 0 : index
    %37 = vector.load %arg7[%c0_19, %c0_20, %c0_21] : memref<1x24x1024xf32, #tpu.memory_space<vmem>>, vector<1x24x1024xf32>
    %38 = vector.shape_cast %37 : vector<1x24x1024xf32> to vector<24x1024xf32>
    %39 = vector.shape_cast %36 : vector<24x1024xf32> to vector<1x24x1024xf32>
    tpu.vector_store %arg7[%c0_19, %c0_20, %c0_21], %39 {strides = array<i32>} : memref<1x24x1024xf32, #tpu.memory_space<vmem>>, vector<1x24x1024xf32>,
    return
  }
  func.func @transform_0(%arg0: i32, %arg1: i32) -> (i32, i32, i32) {
    %c0_i32 = arith.constant 0 : i32
    %c0_i32_0 = arith.constant 0 : i32
    return %arg0, %c0_i32, %arg1 : i32, i32, i32
  }
  func.func @transform_1(%arg0: i32, %arg1: i32) -> (i32, i32) {
    %c0_i32 = arith.constant 0 : i32
    %c0_i32_0 = arith.constant 0 : i32
    %c0_i32_1 = arith.constant 0 : i32
    return %c0_i32, %c0_i32_0 : i32, i32
  }
  func.func @transform_2(%arg0: i32, %arg1: i32) -> (i32, i32) {
    %c0_i32 = arith.constant 0 : i32
    %c0_i32_0 = arith.constant 0 : i32
    %c0_i32_1 = arith.constant 0 : i32
    return %c0_i32, %c0_i32_0 : i32, i32
  }
  func.func @transform_3(%arg0: i32, %arg1: i32) -> (i32, i32) {
    %c0_i32 = arith.constant 0 : i32
    %c0_i32_0 = arith.constant 0 : i32
    return %c0_i32, %arg1 : i32, i32
  }
  func.func @transform_4(%arg0: i32, %arg1: i32) -> (i32, i32, i32) {
    %c0_i32 = arith.constant 0 : i32
    %c0_i32_0 = arith.constant 0 : i32
    return %arg0, %c0_i32, %arg1 : i32, i32, i32
  }
  func.func @transform_5(%arg0: i32, %arg1: i32) -> (i32, i32, i32) {
    %c0_i32 = arith.constant 0 : i32
    %c0_i32_0 = arith.constant 0 : i32
    return %arg0, %c0_i32, %arg1 : i32, i32, i32
  }
}

</mosaic_0001>

<bundles_post_ra>
// kernel: tpu_custom_call.1
= control target key start
LH: loop header
LB: loop body
LE: loop exit
PB: predicated region body
PF: predicated region fallthrough
CT: control target
= control target key end

     0   :  { %11 = vsyncpa [#allocation3], 0  ;;  %s2495_s0 = inlined_call_operand.hbm [shape: bf16[2,8,1024], index: 0, kind: input, shape index: {}]   ;;  %s2496_s1 = inlined_call_operand.vmem [shape: bf16[24,8], index: 1, kind: input, shape index: {}]   ;;  %s2497_s2 = inlined_call_operand.vmem [shape: f32[24,8], index: 2, kind: input, shape index: {}]   ;;  %s2498_s3 = inlined_call_operand.vmem [shape: f32[2,1024], index: 3, kind: input, shape index: {}]   ;;  %s2499_s4 = inlined_call_operand.hbm [shape: f32[2,24,1024], index: 4, kind: output, shape index: {0}]   ;;  %s2500_s5 = inlined_call_operand.hbm [shape: f32[2,24,1024], index: 5, kind: output, shape index: {1}]  }
   0x1   :  { %13 = vsyncpa [#allocation3 + $0x1], 0 }
   0x2   :  { %14 = vsyncpa [#allocation4], 0 }
   0x3   :  { %16 = vsyncpa [#allocation4 + $0x1], 0 }
   0x4   :  { %17 = vsyncpa [#allocation7], 0 }
   0x5   :  { %19 = vsyncpa [#allocation7 + $0x1], 0  ;;  %s1743_s18 = smov 0   ;;  %s1745_s19 = smov 0  }
   0x6   :  { %s1747_s20 = smov 0   ;;  %s1749_s21 = smov 0  }
   0x7   :  { %s1751_s22 = smov 0   ;;  %s1753_s23 = smov 0  }
   0x8 LB: > { %s1298_s24 = sadd.s32 4294967295, %s1700_s23   ;;  %s1299_s25 = sadd.s32 4294967294, %s1700_s23   ;;  %s1700_s23 = sphi %s1753_s23, %s25_s23   ;;  %s1696_s22 = sphi %s1751_s22, %s2578_s22   ;;  %s1692_s21 = sphi %s1749_s21, %s2577_s21   ;;  %s1688_s20 = sphi %s1747_s20, %s2576_s20   ;;  %s1684_s19 = sphi %s1745_s19, %s2575_s19   ;;  %s1680_s18 = sphi %s1743_s18, %s2574_s18  }
   0x9   : > { %s37_s26 = sadd.s32 1, %s1696_s22  ;;  %s46_s27 = sadd.s32 1, %s1688_s20 }
   0xa   : > { %p39_p0 = scmp.ge.s32.totalorder %s37_s26, 2  ;;  %p53_p1 = scmp.ne.s32.totalorder %s1688_s20, %s1684_s19 }
   0xb   : > { %p54_p2 = scmp.eq.s32.totalorder %s1700_s23, 0  ;;  %p59_p3 = scmp.ne.s32.totalorder %s1684_s19, %s1680_s18 }
   0xc   : > { %s2580_s26 = smov (%p39_p0, %s37_s26), 0  ;;  %p60_p5 = scmp.eq.s32.totalorder %s1298_s24, 0 }
   0xd   : > { %p1784_p4 = por %p54_p2, %p53_p1  ;;  %s41_s29 = ssub.s32 %s1696_s22, %s2580_s26 }
   0xe   : > { %p153_p6 = scmp.eq.s32.totalorder %s1298_s24, 1  ;;  %p44_p7 = scmp.eq.s32.totalorder %s41_s29, 0 }
   0xf   : > { %p1790_p8 = por %p60_p5, %p59_p3  ;;  %p159_p10 = scmp.eq.s32.totalorder %s1299_s25, 1 }
  0x10   : > { %p1794_p9 = por %p153_p6, %p53_p1  ;;  %p1380_p13 = scmp.lt.s32.totalorder %s1700_s23, 2 }
  0x11   : > { %s1799_s7 = scalar_select %p44_p7, %s1688_s20, %s46_s27  }
  0x12   : > { %s2508_s6 = scalar_select %p1794_p9, 1, 0 }
  0x13   : > { %p1801_p11 = por %p159_p10, %p59_p3  ;;  %s222_s9 = sand.u32 1, %s1688_s20  }
  0x14   : > { %s1303_s10 = sshll.u32 %s222_s9, 5  ;;  %s1359_s11 = sshll.u32 %s1696_s22, 9 }
  0x15   : > { %s2509_s8 = scalar_select %p1801_p11, 1, 0 }
  0x16   : > { %s1812_s14 = scalar_lea.hbm %s2495_s0, %s1359_s11  ;;  %s226_s15 = scalar_lea.vmem [#allocation2], %s1303_s10 }
  0x17   : > { %s236_s16 = sshll.u32 %s226_s15, 4  ;;  %p1818_p0 = pnand %p1380_p13, %p1784_p4  ;;  %s1814_s16 = int_to_ptr.vmem [resolvable:$true] %s236_s16 }
  0x18   : > { %s223_s24 = scalar_lea.sflag [#allocation3], %s222_s9  ;;  %s1556_s25 = scalar_lea.hbm %s1812_s14, 512 }
  0x19   : > { %p1557_p3 = scmp.ne.s32.totalorder %s1812_s14, %s1556_s25  ;;  %p1558_p5 = pneg %p1818_p0 }
  0x1a   : > { %s1561_s28 = scalar_lea.hbm %s2495_s0, 1024  ;;  %p1562_p4 = scmp.lt.u32.totalorder %s1812_s14, %s2495_s0 }
  0x1b   : > { %p1559_p6 = pnand %p1558_p5, %p1557_p3  ;;  %p1563_p10 = scmp.lt.u32.totalorder %s1561_s28, %s1556_s25 }
  0x1c   : > { %p1565_p12 = scmp.lt.u32.totalorder %s1556_s25, %s1812_s14 }
  0x1d   : > { %p1560_p7 = pneg %p1559_p6  ;;  %p1564_p13 = por %p1563_p10, %p1562_p4 }
  0x1f   : > { %p1566_p1 = por %p1565_p12, %p1564_p13 }
  0x21   : > { %p1567_p2 = pnand %p1566_p1, %p1560_p7 }
  0x23   : > { %1570 = shalt.err (!%p1567_p2)
}
  0x24   : > { %s1571_s9 = scalar_lea.vmem %s1814_s16, 512  ;;  %s1702_s12 = smov [#allocation2]  }
  0x25   : > { %p1572_p3 = scmp.ne.s32.totalorder %s1814_s16, %s1571_s9  ;;  %s1576_s13 = sshll.u32 %s1702_s12, 4  ;;  %s1577_s13 = int_to_ptr.vmem [resolvable:$false] %s1576_s13 }
  0x26   : > { %s1578_s15 = scalar_lea.vmem %s1577_s13, 1024  ;;  %p1579_p9 = scmp.lt.s32.totalorder %s1814_s16, %s1577_s13 }
  0x27   : > { %p1574_p6 = pnand %p1572_p3, %p1558_p5  ;;  %p1580_p4 = scmp.lt.s32.totalorder %s1578_s15, %s1571_s9 }
  0x29   : > { %p1575_p11 = pneg %p1574_p6  ;;  %p1581_p10 = por %p1580_p4, %p1579_p9 }
  0x2b   : > { %p1582_p12 = pnand %p1581_p10, %p1575_p11 }
  0x2d   : > { %1585 = shalt.err (!%p1582_p12)
}
  0x2e   : > { %1372 = dma.hbm_to_vmem [thread:$0]  (!%p1818_p0), %s1812_s14, 512, %s1814_s16, %s223_s24  }
  0x2f   : > { %p2511_p1 = scmp.lt.s32.totalorder %s1700_s23, 3  ;;  %p2512_p2 = scmp.ge.s32.totalorder %s1700_s23, 1 }
  0x31   : > { %p242_p5 = pnand %p2512_p2, %p2511_p1 }
  0x33   : > { %245 = sbr.rel (%p242_p5) target bundleno = 387 (0x183), region = 36 }
  0x3a   : > { %s1854_s25 = sand.u32 1, %s1684_s19  }
  0x3b   : > { %s1307_s27 = sshll.u32 %s1854_s25, 5  ;;  %s248_s29 = scalar_lea.sflag [#allocation3], %s1854_s25 }
  0x3c   : > { %s251_s28 = scalar_lea.vmem [#allocation2], %s1307_s27 }
  0x3d   : > { %1667 = dma.done.wait (%p1790_p8), %s248_s29, 512  }
  0x3e   : > { %1669 = vsyncadd (%p1790_p8), %s248_s29, 4294966784  ;;  %v1703_v0 = vmov 0   ;;  %v301_v1 = vld [vmem:[%s251_s28] sm:$0xff]  ;;  %vm358_vm0 = vcmask 1043456   ;;  %v302_v2 = vld [vmem:[%s251_s28 + $0x8] sm:$0xff]  ;;  %vm351_vm1 = vcmask 64512   ;;  %v909_v37 = vlaneseq }
  0x3f   : > { %415 = vmatprep.mubr.bf16.mxu0 %v1703_v0  ;;  %466 = vmatprep.mubr.bf16.mxu1 %v1703_v0  ;;  %v1311_v3 = vcombine.high %v301_v1, %v301_v1  ;;  %v1313_v4 = vcombine.high %v302_v2, %v302_v2  ;;  %v1310_v5 = vcombine.low %v301_v1, %v301_v1  ;;  %v303_v7 = vld [vmem:[%s251_s28 + $0x10] sm:$0xff]  ;;  %v304_v9 = vld [vmem:[%s251_s28 + $0x18] sm:$0xff]  ;;  %v1454_v13 = vld [vmem:[%s2496_s1] sm:$0xff]   ;;  %v1704_v21 = vmov 1   ;;  %s1360_s30 = smul.u32 192, %s1854_s25  ;;  %s1123_s9 = scalar_lea.sflag [#allocation4], %s1854_s25 }
  0x40   : > { %1439 = vset.pattern.permute.xlu1 %v1703_v0  ;;  %1438 = vset.pattern.permute.xlu0 %v1703_v0  ;;  %v1312_v6 = vcombine.low %v302_v2, %v302_v2  ;;  %v1315_v8 = vcombine.high %v303_v7, %v303_v7  ;;  %v1314_v10 = vcombine.low %v303_v7, %v303_v7  ;;  %v307_v16 = vld [vmem:[%s2497_s2 + $0x10] sm:$0xff]  ;;  %v305_v17 = vld [vmem:[%s2497_s2] sm:$0xff]  ;;  %v306_v20 = vld [vmem:[%s2497_s2 + $0x8] sm:$0xff]  ;;  %v1705_v23 = vmov 2   ;;  %s1361_s16 = smul.u32 3072, %s1692_s21  ;;  %p2542_p9 = scmp.ne.s32.totalorder %s2508_s6, 0 }
  0x41   : > { %1318 = vmatprep.subr.msk.bf16.mxu0 %vm358_vm0, %v1311_v3  ;;  %1321 = vmatprep.subr.msk.bf16.mxu1 %vm358_vm0, %v1313_v4  ;;  %v360_v11 = vsel %vm358_vm0, %v1310_v5, 0  ;;  %v1317_v14 = vcombine.high %v304_v9, %v304_v9  ;;  %v1316_v15 = vcombine.low %v304_v9, %v304_v9  ;;  %v1459_v22 = vld [vmem:[%s2496_s1 + $0x8] ss:$0 sps:$4 sm:$0xff]   ;;  %v1706_v24 = vmov 3   ;;  %v1354_v48 = vld [vmem:[%s2498_s3 + $0x1] ss:$2 sm:$0xff] }
  0x42   : > { %v366_v12 = vsel %vm358_vm0, %v1312_v6, 0  ;;  %384 = vmatpush1.bf16.msra.mxu0 %v360_v11  ;;  %v372_v18 = vsel %vm358_vm0, %v1314_v10, 0  ;;  %320 = vperm.xlu1 %1439, %v307_v16   ;;  %v1707_v25 = vmov 4   ;;  %v1708_v26 = vmov 5   ;;  %v758_v42 = vld [vmem:[%s2498_s3] ss:$2 sm:$0xff]  ;;  %s2186_s11 = scalar_lea.hbm %s2499_s4, %s1361_s16 }
  0x43   : > { %435 = vmatpush1.bf16.msra.mxu1 %v366_v12  ;;  %1324 = vmatprep.subr.msk.bf16.mxu0 %vm358_vm0, %v1315_v8  ;;  %v378_v19 = vsel %vm358_vm0, %v1316_v15, 0  ;;  %v910_v39 = vshrl.u32 %v909_v37, 7  ;;  %s2018_s14 = scalar_lea.vmem [#allocation5], %s1360_s30  ;;  %s1709_s13 = smov [#allocation5]  }
  0x44   : > { %1327 = vmatprep.subr.msk.bf16.mxu1 %vm358_vm0, %v1317_v14  ;;  %310 = vperm.xlu0 %1438, %v305_v17   ;;  %s1143_s17 = sshll.u32 %s2018_s14, 4  ;;  %s1590_s15 = sshll.u32 %s1709_s13, 4  ;;  %s2194_s17 = int_to_ptr.vmem [resolvable:$true] %s1143_s17  ;;  %s1591_s15 = int_to_ptr.vmem [resolvable:$false] %s1590_s15 }
  0x45   : > { %1319 = vmatmul.mubr.msk.bf16.vlgmr.msra.gmra.mrb[0].mxu0 %vm351_vm1, %v1454_v13  ;;  %v911_v41 = vsub.s32 0, %v910_v39  ;;  %v915_v43 = vsub.s32 1, %v910_v39  ;;  %v919_v44 = vsub.s32 2, %v910_v39  ;;  %v923_v45 = vsub.s32 3, %v910_v39  ;;  %s1586_s12 = scalar_lea.vmem %s2194_s17, 3072  ;;  %s1592_s27 = scalar_lea.vmem %s1591_s15, 6144 }
  0x46   : > { %1322 = vmatmul.mubr.msk.bf16.vlgmr.msra.gmra.mrb[0].mxu1 %vm351_vm1, %v1454_v13  ;;  %486 = vmatpush1.bf16.msra.mxu0 %v372_v18  ;;  %v927_v47 = vsub.s32 4, %v910_v39  ;;  %v931_v49 = vsub.s32 5, %v910_v39  ;;  %v935_v50 = vsub.s32 6, %v910_v39  ;;  %v939_v51 = vsub.s32 7, %v910_v39  ;;  %p1587_p8 = scmp.ne.s32.totalorder %s2194_s17, %s1586_s12  ;;  %p1593_p7 = scmp.lt.s32.totalorder %s2194_s17, %s1591_s15 }
  0x47   : > { %537 = vmatpush1.bf16.msra.mxu1 %v378_v19  ;;  %425 = vmatprep.mubr.bf16.mxu0 %v1703_v0  ;;  %v1923_v52 = vrot.slane %v758_v42, %v911_v41  ;;  %v1927_v54 = vrot.slane %v758_v42, %v915_v43  ;;  %v1929_v55 = vrot.slane %v758_v42, %v919_v44  ;;  %p1594_p13 = scmp.lt.s32.totalorder %s1592_s27, %s1586_s12 }
  0x48   : > { %476 = vmatprep.mubr.bf16.mxu1 %v1703_v0  ;;  %1440 = vset.pattern.permute.xlu1 %v1704_v21  ;;  %v1931_v56 = vrot.slane %v758_v42, %v923_v45  ;;  %v1933_v57 = vrot.slane %v1354_v48, %v911_v41  ;;  %v1935_v58 = vrot.slane %v758_v42, %v927_v47  ;;  %p1588_p11 = pnand %p1587_p8, %p2542_p9 }
  0x49   : > { %315 = vperm.xlu0 %1438, %v306_v20   ;;  %763 = vperm.xlu1 %1440, %v305_v17   ;;  %v1937_v59 = vrot.slane %v1354_v48, %v915_v43  ;;  %v1939_v60 = vrot.slane %v1354_v48, %v919_v44  ;;  %v1941_v61 = vrot.slane %v1354_v48, %v923_v45  ;;  %p1595_p3 = por %p1594_p13, %p1593_p7 }
  0x4a   : > { %v1944_v62 = vrot.slane %v758_v42, %v931_v49  ;;  %v1946_v63 = vrot.slane %v758_v42, %v935_v50  ;;  %v1950_v1 = vrot.slane %v1354_v48, %v927_v47  ;;  %v1955_v4 = vrot.slane %v1354_v48, %v931_v49  ;;  %p1589_p0 = pneg %p1588_p11 }
  0x4b   : > { %v1957_v5 = vrot.slane %v1354_v48, %v935_v50  ;;  %v1959_v6 = vrot.slane %v1354_v48, %v939_v51 }
  0x4c   : > { %p1596_p6 = pnand %p1595_p3, %p1589_p0 }
  0x4d   : > { %1441 = vset.pattern.permute.xlu0 %v1704_v21  ;;  %1320 = vmatmul.mubr.msk.bf16.gmra.mrb[4].mxu0 %vm351_vm1, %v1459_v22 }
  0x4e   : > { %1323 = vmatmul.mubr.msk.bf16.gmra.mrb[4].mxu1 %vm351_vm1, %v1459_v22  ;;  %517 = vmatprep.mubr.bf16.mxu0 %v1703_v0 }
  0x4f   : > { %568 = vmatprep.mubr.bf16.mxu1 %v1703_v0  ;;  %773 = vperm.xlu1 %1440, %v307_v16  }
  0x50   : > { %768 = vperm.xlu0 %1441, %v306_v20  }
  0x53   : > { %1442 = vset.pattern.permute.xlu1 %v1705_v23 }
  0x54   : > { %1443 = vset.pattern.permute.xlu0 %v1705_v23  ;;  %801 = vperm.xlu1 %1442, %v305_v17  }
  0x55   : > { %805 = vperm.xlu0 %1443, %v306_v20   ;;  %1325 = vmatmul.mubr.msk.bf16.vlgmr.msra.gmra.mrb[8].mxu0 %vm351_vm1, %v1454_v13 }
  0x56   : > { %1328 = vmatmul.mubr.msk.bf16.vlgmr.msra.gmra.mrb[8].mxu1 %vm351_vm1, %v1454_v13  ;;  %527 = vmatprep.mubr.bf16.mxu0 %v1703_v0 }
  0x57   : > { %578 = vmatprep.mubr.bf16.mxu1 %v1703_v0  ;;  %v1948_v0 = vrot.slane %v758_v42, %v939_v51 }
  0x58   : > { %809 = vperm.xlu1 %1442, %v307_v16  }
  0x59   : > { %1445 = vset.pattern.permute.xlu0 %v1706_v24 }
  0x5a   : > { %865 = vperm.xlu0 %1445, %v306_v20  }
  0x5c   : > { %1444 = vset.pattern.permute.xlu1 %v1706_v24 }
  0x5d   : > { %1326 = vmatmul.mubr.msk.bf16.gmra.mrb[12].mxu0 %vm351_vm1, %v1459_v22  ;;  %861 = vperm.xlu1 %1444, %v305_v17  }
  0x5e   : > { %1329 = vmatmul.mubr.msk.bf16.gmra.mrb[12].mxu1 %vm351_vm1, %v1459_v22  ;;  %1447 = vset.pattern.permute.xlu0 %v1707_v25 }
  0x5f   : > { %901 = vperm.xlu0 %1447, %v306_v20  }
  0x61   : > { %869 = vperm.xlu1 %1444, %v307_v16  }
  0x63   : > { %1449 = vset.pattern.permute.xlu0 %v1708_v26 }
  0x64   : > { %1002 = vperm.xlu0 %1449, %v306_v20  }
  0x65   : > { %1446 = vset.pattern.permute.xlu1 %v1707_v25 }
  0x66   : > { %897 = vperm.xlu1 %1446, %v305_v17  }
  0x6a   : > { %905 = vperm.xlu1 %1446, %v307_v16  }
  0x6e   : > { %1448 = vset.pattern.permute.xlu1 %v1708_v26 }
  0x6f   : > { %998 = vperm.xlu1 %1448, %v305_v17  }
  0x73   : > { %1006 = vperm.xlu1 %1448, %v307_v16  }
  0xc1   : > { %v1893_v27 = vpop.permute.xlu1 %320 }
  0xc3   : > { %v1897_v29 = vpop.permute.xlu0 %310 }
  0xc8   : > { %v1895_v28 = vpop.permute.xlu1 %763  ;;  %v1901_v31 = vpop.permute.xlu0 %315 }
  0xce   : > { %v1899_v30 = vpop.permute.xlu1 %773 }
  0xcf   : > { %2513 = vst [vmem:[#allocation11_spill] sm:$0xff] %v1899_v30  ;;  %v1905_v33 = vpop.permute.xlu0 %768 }
  0xd3   : > { %v1903_v32 = vpop.permute.xlu1 %801 }
  0xd4   : > { %v1909_v35 = vpop.permute.xlu0 %805 }
  0xd7   : > { %v1907_v34 = vpop.permute.xlu1 %809 }
  0xd9   : > { %v1913_v38 = vpop.permute.xlu0 %865 }
  0xdc   : > { %v1911_v36 = vpop.permute.xlu1 %861 }
  0xdd   : > { %2514 = vst [vmem:[#allocation12_spill] sm:$0xff] %v1911_v36 }
  0xde   : > { %v902_v46 = vpop.permute.xlu0 %901 }
  0xdf   : > { %v1953_v3 = vmul.f32 %v1923_v52, %v902_v46  ;;  %v1962_v7 = vmul.f32 %v1927_v54, %v902_v46  ;;  %v1965_v8 = vmul.f32 %v1929_v55, %v902_v46  ;;  %v1968_v9 = vmul.f32 %v1931_v56, %v902_v46 }
  0xe0   : > { %v1915_v40 = vpop.permute.xlu1 %869  ;;  %v1971_v10 = vmul.f32 %v1935_v58, %v902_v46  ;;  %v1976_v12 = vmul.f32 %v1944_v62, %v902_v46  ;;  %v1979_v13 = vmul.f32 %v1946_v63, %v902_v46  ;;  %v1982_v14 = vmul.f32 %v1948_v0, %v902_v46 }
  0xe2   : > { %2515 = vst [vmem:[#allocation13_spill] sm:$0xff] %v1971_v10  ;;  %2516 = vst [vmem:[#allocation14_spill] sm:$0xff] %v1976_v12 }
  0xe3   : > { %v1003_v2 = vpop.permute.xlu0 %1002  ;;  %2517 = vst [vmem:[#allocation15_spill] sm:$0xff] %v1979_v13  ;;  %2518 = vst [vmem:[#allocation16_spill] sm:$0xff] %v1982_v14 }
  0xe4   : > { %v1985_v15 = vmul.f32 %v1933_v57, %v1003_v2  ;;  %v1988_v18 = vmul.f32 %v1937_v59, %v1003_v2  ;;  %v1991_v19 = vmul.f32 %v1939_v60, %v1003_v2  ;;  %v1994_v20 = vmul.f32 %v1941_v61, %v1003_v2 }
  0xe5   : > { %v1925_v53 = vpop.permute.xlu1 %897  ;;  %v1997_v21 = vmul.f32 %v1950_v1, %v1003_v2  ;;  %v2002_v26 = vmul.f32 %v1955_v4, %v1003_v2  ;;  %v2005_v37 = vmul.f32 %v1957_v5, %v1003_v2  ;;  %v2014_v45 = vmul.f32 %v1959_v6, %v1003_v2 }
  0xe6   : > { %v2011_v44 = vmul.f32 %v1923_v52, %v1925_v53 }
  0xe7   : > { %2519 = vst [vmem:[#allocation17_spill] sm:$0xff] %v1997_v21  ;;  %2520 = vst [vmem:[#allocation18_spill] sm:$0xff] %v2002_v26 }
  0xe8   : > { %2521 = vst [vmem:[#allocation19_spill] sm:$0xff] %v2005_v37  ;;  %2522 = vst [vmem:[#allocation20_spill] sm:$0xff] %v2014_v45  ;;  %v2058_v45 = vmul.f32 %v1948_v0, %v1925_v53 }
  0xe9   : > { %v1973_v11 = vpop.permute.xlu1 %905 }
  0xea   : > { %2526 = vst [vmem:[#allocation24_spill] sm:$0xff] %v2058_v45 }
 0x118   : > { %v417_v16 = vpop.f32.mrb[0].mxu0 }
 0x119   : > { %v468_v17 = vpop.f32.mrb[0].mxu1  ;;  %v418_v22 = vadd.f32 %v417_v16, %v1897_v29  ;;  %v419_v24 = vpop.f32.mrb[1].mxu0 }
 0x11a   : > { %v469_v23 = vadd.f32 %v468_v17, %v1897_v29  ;;  %v470_v25 = vpop.f32.mrb[1].mxu1  ;;  %v420_v39 = vadd.f32 %v419_v24, %v1897_v29  ;;  %v421_v42 = vpop.f32.mrb[2].mxu0 }
 0x11b   : > { %v471_v41 = vadd.f32 %v470_v25, %v1897_v29  ;;  %v472_v43 = vpop.f32.mrb[2].mxu1  ;;  %587 = vst [vmem:[%s2018_s14] sm:$0xff] %v418_v22  ;;  %v1330_v46 = vmul.f32 -1.442695, %v418_v22  ;;  %v422_v48 = vadd.f32 %v421_v42, %v1901_v31  ;;  %v423_v50 = vpop.f32.mrb[3].mxu0  ;;  %v2036_v25 = vmul.f32 %v1929_v55, %v1925_v53 }
 0x11c   : > { %589 = vst [vmem:[%s2018_s14 + $0x10] sm:$0xff] %v469_v23  ;;  %v1332_v47 = vmul.f32 -1.442695, %v469_v23  ;;  %v473_v49 = vadd.f32 %v472_v43, %v1901_v31  ;;  %v474_v51 = vpop.f32.mrb[3].mxu1  ;;  %588 = vst [vmem:[%s2018_s14 + $0x8] sm:$0xff] %v420_v39  ;;  %v424_v17 = vadd.f32 %v423_v50, %v1901_v31  ;;  %v2032_v23 = vmul.f32 %v1927_v54, %v1925_v53 }
 0x11d   : > { %v1331_v2 = vmul.f32 -1.442695, %v420_v39  ;;  %590 = vst [vmem:[%s2018_s14 + $0x18] sm:$0xff] %v471_v41  ;;  %v1333_v16 = vmul.f32 -1.442695, %v471_v41  ;;  %v475_v24 = vadd.f32 %v474_v51, %v1901_v31  ;;  %1460 = vpow2.f32 %v1330_v46  ;;  %595 = vst [vmem:[%s2018_s14 + $0x40] sm:$0xff] %v422_v48 }
 0x11e   : > { %v1338_v22 = vmul.f32 -1.442695, %v422_v48  ;;  %597 = vst [vmem:[%s2018_s14 + $0x50] sm:$0xff] %v473_v49  ;;  %1462 = vpow2.f32 %v1332_v47  ;;  %v1340_v39 = vmul.f32 -1.442695, %v473_v49  ;;  %596 = vst [vmem:[%s2018_s14 + $0x48] sm:$0xff] %v424_v17  ;;  %v2042_v41 = vmul.f32 %v1931_v56, %v1925_v53  ;;  %v999_v48 = vpop.permute.xlu1 %998 }
 0x11f   : > { %598 = vst [vmem:[%s2018_s14 + $0x58] sm:$0xff] %v475_v24  ;;  %v2046_v42 = vmul.f32 %v1935_v58, %v1925_v53  ;;  %1464 = vpow2.f32 %v1331_v2  ;;  %v1339_v43 = vmul.f32 -1.442695, %v424_v17  ;;  %v2050_v46 = vmul.f32 %v1944_v62, %v1925_v53 }
 0x120   : > { %v2054_v47 = vmul.f32 %v1946_v63, %v1925_v53  ;;  %1466 = vpow2.f32 %v1333_v16  ;;  %v1341_v49 = vmul.f32 -1.442695, %v475_v24  ;;  %v427_v50 = vpop.f32.mrb[4].mxu0  ;;  %v2062_v2 = vmul.f32 %v1923_v52, %v1973_v11 }
 0x121   : > { %2523 = vst [vmem:[#allocation21_spill] sm:$0xff] %v2046_v42  ;;  %2524 = vst [vmem:[#allocation22_spill] sm:$0xff] %v2050_v46  ;;  %v478_v51 = vpop.f32.mrb[4].mxu1  ;;  %1468 = vpow2.f32 %v1338_v22  ;;  %v428_v17 = vadd.f32 %v427_v50, %v1893_v27  ;;  %v429_v26 = vpop.f32.mrb[5].mxu0  ;;  %v2068_v24 = vmul.f32 %v1927_v54, %v1973_v11  ;;  %v2074_v22 = vmul.f32 %v1929_v55, %v1973_v11 }
 0x122   : > { %2525 = vst [vmem:[#allocation23_spill] sm:$0xff] %v2054_v47  ;;  %v479_v37 = vadd.f32 %v478_v51, %v1893_v27  ;;  %v480_v16 = vpop.f32.mrb[5].mxu1  ;;  %1470 = vpow2.f32 %v1340_v39  ;;  %v430_v53 = vadd.f32 %v429_v26, %v1893_v27  ;;  %v431_v21 = vpop.f32.mrb[6].mxu0  ;;  %v2080_v39 = vmul.f32 %v1931_v56, %v1973_v11 }
 0x123   : > { %v481_v52 = vadd.f32 %v480_v16, %v1893_v27  ;;  %v482_v14 = vpop.f32.mrb[6].mxu1  ;;  %1472 = vpow2.f32 %v1339_v43  ;;  %603 = vst [vmem:[%s2018_s14 + $0x80] sm:$0xff] %v428_v17  ;;  %v1346_v50 = vmul.f32 -1.442695, %v428_v17  ;;  %v432_v54 = vpop.f32.mrb[7].mxu0  ;;  %v2086_v55 = vmul.f32 %v1935_v58, %v1973_v11 }
 0x124   : > { %605 = vst [vmem:[%s2018_s14 + $0x90] sm:$0xff] %v479_v37  ;;  %v1348_v51 = vmul.f32 -1.442695, %v479_v37  ;;  %v483_v13 = vpop.f32.mrb[7].mxu1  ;;  %1474 = vpow2.f32 %v1341_v49  ;;  %604 = vst [vmem:[%s2018_s14 + $0x88] sm:$0xff] %v430_v53  ;;  %v2090_v21 = vmul.f32 %v1944_v62, %v1973_v11  ;;  %v2098_v56 = vmul.f32 %v1948_v0, %v1973_v11  ;;  %v2109_v62 = vpop.permute.xlu1 %1006 }
 0x125   : > { %v1347_v26 = vmul.f32 -1.442695, %v430_v53  ;;  %606 = vst [vmem:[%s2018_s14 + $0x98] sm:$0xff] %v481_v52  ;;  %v1349_v14 = vmul.f32 -1.442695, %v481_v52  ;;  %2527 = vst [vmem:[#allocation25_spill] sm:$0xff] %v2086_v55  ;;  %1476 = vpow2.f32 %v1346_v50  ;;  %v2094_v13 = vmul.f32 %v1946_v63, %v1973_v11 }
 0x126   : > { %2528 = vst [vmem:[#allocation26_spill] sm:$0xff] %v2090_v21  ;;  %2530 = vst [vmem:[#allocation28_spill] sm:$0xff] %v2098_v56  ;;  %1478 = vpow2.f32 %v1348_v51  ;;  %v2101_v37 = vmul.f32 %v1933_v57, %v999_v48  ;;  %v2104_v58 = vmul.f32 %v1937_v59, %v999_v48  ;;  %v2107_v43 = vmul.f32 %v1939_v60, %v999_v48 }
 0x127   : > { %2529 = vst [vmem:[#allocation27_spill] sm:$0xff] %v2094_v13  ;;  %v1461_v49 = vpop.eup %1460  ;;  %1480 = vpow2.f32 %v1347_v26  ;;  %v2112_v63 = vmul.f32 %v1941_v61, %v999_v48  ;;  %v2115_v0 = vmul.f32 %v1950_v1, %v999_v48  ;;  %v2118_v11 = vmul.f32 %v1955_v4, %v999_v48 }
 0x128   : > { %v1463_v17 = vpop.eup %1462  ;;  %v683_v16 = vadd.f32 1.0, %v1461_v49  ;;  %1482 = vpow2.f32 %v1349_v14  ;;  %v519_v53 = vpop.f32.mrb[8].mxu0  ;;  %v2121_v50 = vmul.f32 %v1957_v5, %v999_v48  ;;  %v2124_v51 = vmul.f32 %v1959_v6, %v999_v48 }
 0x129   : > { %2531 = vst [vmem:[#allocation29_spill] sm:$0xff] %v2115_v0  ;;  %2532 = vst [vmem:[#allocation30_spill] sm:$0xff] %v2118_v11  ;;  %v570_v52 = vpop.f32.mrb[8].mxu1  ;;  %v1465_v54 = vpop.eup %1464  ;;  %v685_v26 = vadd.f32 1.0, %v1463_v17  ;;  %v520_v56 = vadd.f32 %v519_v53, %v1897_v29  ;;  %v2130_v14 = vmul.f32 %v1933_v57, %v2109_v62  ;;  %v2138_v57 = vmul.f32 %v1937_v59, %v2109_v62 }
 0x12a   : > { %2533 = vst [vmem:[#allocation31_spill] sm:$0xff] %v2121_v50  ;;  %2534 = vst [vmem:[#allocation32_spill] sm:$0xff] %v2124_v51  ;;  %v571_v13 = vadd.f32 %v570_v52, %v1897_v29  ;;  %v521_v21 = vpop.f32.mrb[9].mxu0  ;;  %v572_v55 = vpop.f32.mrb[9].mxu1  ;;  %1484 = vrcp.f32 %v683_v16  ;;  %v684_v12 = vadd.f32 1.0, %v1465_v54  ;;  %v2142_v16 = vmul.f32 %v1939_v60, %v2109_v62 }
 0x12b   : > { %v1467_v49 = vpop.eup %1466  ;;  %v522_v48 = vadd.f32 %v521_v21, %v1897_v29  ;;  %v573_v17 = vadd.f32 %v572_v55, %v1897_v29  ;;  %v523_v10 = vpop.f32.mrb[10].mxu0  ;;  %1486 = vrcp.f32 %v685_v26  ;;  %591 = vst [vmem:[%s2018_s14 + $0x20] sm:$0xff] %v520_v56  ;;  %2535 = vst [vmem:[#allocation33_spill] sm:$0xff] %v2138_v57  ;;  %v2148_v55 = vmul.f32 %v1941_v61, %v2109_v62 }
 0x12c   : > { %v574_v53 = vpop.f32.mrb[10].mxu1  ;;  %v1469_v51 = vpop.eup %1468  ;;  %v686_v52 = vadd.f32 1.0, %v1467_v49  ;;  %593 = vst [vmem:[%s2018_s14 + $0x30] sm:$0xff] %v571_v13  ;;  %2536 = vst [vmem:[#allocation34_spill] sm:$0xff] %v2142_v16  ;;  %1488 = vrcp.f32 %v684_v12  ;;  %v2152_v59 = vmul.f32 %v1950_v1, %v2109_v62  ;;  %v524_v12 = vadd.f32 %v523_v10, %v1901_v31 }
 0x12d   : > { %v525_v50 = vpop.f32.mrb[11].mxu0  ;;  %v1471_v21 = vpop.eup %1470  ;;  %v691_v54 = vadd.f32 1.0, %v1469_v51  ;;  %592 = vst [vmem:[%s2018_s14 + $0x28] sm:$0xff] %v522_v48  ;;  %594 = vst [vmem:[%s2018_s14 + $0x38] sm:$0xff] %v573_v17  ;;  %v575_v51 = vadd.f32 %v574_v53, %v1901_v31  ;;  %v2163_v10 = vmul.f32 %v1955_v4, %v2109_v62  ;;  %v2167_v53 = vmul.f32 %v1957_v5, %v2109_v62 }
 0x12e   : > { %v576_v29 = vpop.f32.mrb[11].mxu1  ;;  %2537 = vst [vmem:[#allocation35_spill] sm:$0xff] %v2148_v55  ;;  %2538 = vst [vmem:[#allocation36_spill] sm:$0xff] %v2152_v59  ;;  %v1473_v26 = vpop.eup %1472  ;;  %1490 = vrcp.f32 %v686_v52  ;;  %v693_v60 = vadd.f32 1.0, %v1471_v21  ;;  %v526_v61 = vadd.f32 %v525_v50, %v1901_v31  ;;  %v2170_v21 = vmul.f32 -1.442695, %v571_v13 }
 0x12f   : > { %v1475_v49 = vpop.eup %1474  ;;  %1492 = vrcp.f32 %v691_v54  ;;  %v692_v16 = vadd.f32 1.0, %v1473_v26  ;;  %v577_v55 = vadd.f32 %v576_v29, %v1901_v31  ;;  %599 = vst [vmem:[%s2018_s14 + $0x60] sm:$0xff] %v524_v12  ;;  %601 = vst [vmem:[%s2018_s14 + $0x70] sm:$0xff] %v575_v51  ;;  %v1334_v31 = vmul.f32 -1.442695, %v520_v56 }
 0x130   : > { %v1477_v1 = vpop.eup %1476  ;;  %1494 = vrcp.f32 %v693_v60  ;;  %v694_v59 = vadd.f32 1.0, %v1475_v49  ;;  %2539 = vst [vmem:[#allocation37_spill] sm:$0xff] %v2163_v10  ;;  %2540 = vst [vmem:[#allocation38_spill] sm:$0xff] %v2167_v53  ;;  %v529_v54 = vpop.f32.mrb[12].mxu0  ;;  %v2174_v4 = vmul.f32 -1.442695, %v522_v48 }
 0x131   : > { %v1479_v50 = vpop.eup %1478  ;;  %1496 = vrcp.f32 %v692_v16  ;;  %v699_v52 = vadd.f32 1.0, %v1477_v1  ;;  %600 = vst [vmem:[%s2018_s14 + $0x68] sm:$0xff] %v526_v61  ;;  %602 = vst [vmem:[%s2018_s14 + $0x78] sm:$0xff] %v577_v55  ;;  %v530_v5 = vadd.f32 %v529_v54, %v1893_v27  ;;  %v580_v60 = vpop.f32.mrb[12].mxu1 }
 0x132   : > { %v1481_v29 = vpop.eup %1480  ;;  %1498 = vrcp.f32 %v694_v59  ;;  %v701_v26 = vadd.f32 1.0, %v1479_v50  ;;  %v531_v49 = vpop.f32.mrb[13].mxu0  ;;  %v581_v13 = vadd.f32 %v580_v60, %v1893_v27  ;;  %v2188_v50 = vmul.f32 -1.442695, %v573_v17 }
 0x133   : > { %v1483_v16 = vpop.eup %1482  ;;  %1500 = vrcp.f32 %v699_v52  ;;  %v700_v56 = vadd.f32 1.0, %v1481_v29  ;;  %v2179_v1 = vadd.f32 %v531_v49, %v1893_v27  ;;  %v582_v53 = vpop.f32.mrb[13].mxu1  ;;  %607 = vst [vmem:[%s2018_s14 + $0xa0] sm:$0xff] %v530_v5  ;;  %v2196_v49 = vmul.f32 -1.442695, %v524_v12 }
 0x134   : > { %v533_v59 = vpop.f32.mrb[14].mxu0  ;;  %1502 = vrcp.f32 %v701_v26  ;;  %v702_v48 = vadd.f32 1.0, %v1483_v16  ;;  %v583_v52 = vadd.f32 %v582_v53, %v1893_v27  ;;  %v584_v54 = vpop.f32.mrb[14].mxu1  ;;  %609 = vst [vmem:[%s2018_s14 + $0xb0] sm:$0xff] %v581_v13  ;;  %v2205_v27 = vmul.f32 %v1959_v6, %v2109_v62 }
 0x135   : > { %v534_v29 = vpop.f32.mrb[15].mxu0  ;;  %v1485_v60 = vpop.eup %1484  ;;  %1504 = vrcp.f32 %v700_v56  ;;  %v2198_v59 = vmul.f32 -1.442695, %v575_v51  ;;  %608 = vst [vmem:[%s2018_s14 + $0xa8] sm:$0xff] %v2179_v1  ;;  %v1343_v12 = vmul.f32 -1.442695, %v526_v61 }
 0x136   : > { %v585_v17 = vpop.f32.mrb[15].mxu1  ;;  %2541 = vst [vmem:[#allocation39_spill] sm:$0xff] %v2205_v27  ;;  %v1487_v53 = vpop.eup %1486  ;;  %v776_v26 = vmul.f32 %v1485_v60, %v1895_v28  ;;  %1506 = vrcp.f32 %v702_v48  ;;  %v2208_v16 = vmul.f32 -1.442695, %v577_v55  ;;  %610 = vst [vmem:[%s2018_s14 + $0xb8] sm:$0xff] %v583_v52 }
 0x137   : > { %v1489_v51 = vpop.eup %1488  ;;  %v778_v56 = vmul.f32 %v1487_v53, %v1895_v28  ;;  %1508 = vpow2.f32 %v1334_v31  ;;  %v2212_v54 = vmul.f32 -1.442695, %v530_v5  ;;  %v2214_v29 = vmul.f32 -1.442695, %v581_v13 }
 0x138   : > { %1599 = shalt.err (!%p1596_p6)
}
 0x139   : > { %s1600_s29 = scalar_lea.hbm %s2186_s11, 3072  ;;  %s1604_s24 = scalar_lea.hbm %s2499_s4, 6144 }
 0x13a   : > { %p1601_p4 = scmp.ne.s32.totalorder %s2186_s11, %s1600_s29  ;;  %p1605_p1 = scmp.lt.u32.totalorder %s2186_s11, %s2499_s4 }
 0x13b   : > { %p1606_p2 = scmp.lt.u32.totalorder %s1604_s24, %s1600_s29  ;;  %p1608_p8 = scmp.lt.u32.totalorder %s1600_s29, %s2186_s11 }
 0x13c   : > { %p1602_p10 = pnand %p1601_p4, %p2542_p9 }
 0x13d   : > { %p1607_p5 = por %p1606_p2, %p1605_p1 }
 0x13e   : > { %p1603_p12 = pneg %p1602_p10 }
 0x13f   : > { %p1609_p11 = por %p1608_p8, %p1607_p5 }
 0x141   : > { %p1610_p0 = pnand %p1609_p11, %p1603_p12 }
 0x143   : > { %1613 = shalt.err (!%p1610_p0)
}
 0x144   : > { %s1710_s12 = smov 1024   ;;  %s1711_s15 = smov 64   ;;  %v1491_v6 = vpop.eup %1490  ;;  %v777_v62 = vmul.f32 %v1489_v51, %v1895_v28  ;;  %v812_v55 = vadd.f32 %v1903_v32, %v776_v26  ;;  %1510 = vpow2.f32 %v2170_v21  ;;  %v1351_v61 = vmul.f32 -1.442695, %v2179_v1 }
 0x145   : > { %1365 = dma.vmem_to_hbm [thread:$0]  (%p2542_p9), %s2194_s17, 3072, %s2186_s11, %s1123_s9, %s1710_s12, %s1710_s12, %s1711_s15   ;;  %v2247_v31 = vpop.eup %1492  ;;  %v779_v5 = vmul.f32 %v1491_v6, %v1895_v28  ;;  %v814_v13 = vadd.f32 %v1903_v32, %v778_v56  ;;  %1512 = vpow2.f32 %v2174_v4  ;;  %v1353_v48 = vmul.f32 -1.442695, %v583_v52 }
 0x146   : > { %v2252_v17 = vpop.eup %1494  ;;  %v813_v27 = vadd.f32 %v1903_v32, %v777_v62  ;;  %1514 = vpow2.f32 %v2188_v50  ;;  %v836_v26 = vmul.f32 %v1485_v60, %v812_v55  ;;  %v784_v21 = vmul.f32 %v2247_v31, %v1905_v33  ;;  %s2320_s17 = scalar_lea.vmem [#allocation6], %s1360_s30  ;;  %s2434_s27 = scalar_lea.hbm %s2500_s5, %s1361_s16 }
 0x147   : > { %v2258_v1 = vpop.eup %1496  ;;  %v815_v10 = vadd.f32 %v1903_v32, %v779_v5  ;;  %1516 = vpow2.f32 %v2196_v49  ;;  %v838_v56 = vmul.f32 %v1487_v53, %v814_v13  ;;  %v786_v4 = vmul.f32 %v2252_v17, %v1905_v33  ;;  %s1161_s30 = sshll.u32 %s2320_s17, 4  ;;  %s1128_s29 = scalar_lea.sflag [#allocation7], %s1854_s25  ;;  %s2436_s30 = int_to_ptr.vmem [resolvable:$true] %s1161_s30 }
 0x148   : > { %v2264_v52 = vpop.eup %1498  ;;  %1518 = vpow2.f32 %v2198_v59  ;;  %v837_v62 = vmul.f32 %v1489_v51, %v813_v27  ;;  %v872_v50 = vadd.f32 %v1911_v36, %v836_v26  ;;  %v785_v60 = vmul.f32 %v2258_v1, %v1905_v33  ;;  %s1614_s28 = scalar_lea.vmem %s2436_s30, 3072  ;;  %s1712_s21 = smov [#allocation6]  }
 0x149   : > { %v1501_v55 = vpop.eup %1500  ;;  %1520 = vpow2.f32 %v1343_v12  ;;  %v839_v57 = vmul.f32 %v1491_v6, %v815_v10  ;;  %v874_v5 = vadd.f32 %v1911_v36, %v838_v56  ;;  %v787_v49 = vmul.f32 %v2264_v52, %v1905_v33  ;;  %p1615_p7 = scmp.ne.s32.totalorder %s2436_s30, %s1614_s28  ;;  %s1618_s16 = sshll.u32 %s1712_s21, 4  ;;  %s1619_s16 = int_to_ptr.vmem [resolvable:$false] %s1618_s16 }
 0x14a   : > { %v1503_v53 = vpop.eup %1502  ;;  %v792_v13 = vmul.f32 %v1501_v55, %v1899_v30  ;;  %1522 = vpow2.f32 %v2208_v16  ;;  %v873_v59 = vadd.f32 %v1911_v36, %v837_v62  ;;  %v820_v27 = vadd.f32 %v1909_v35, %v784_v21  ;;  %s1620_s14 = scalar_lea.vmem %s1619_s16, 6144  ;;  %p1621_p6 = scmp.lt.s32.totalorder %s2436_s30, %s1619_s16 }
 0x14b   : > { %v1505_v51 = vpop.eup %1504  ;;  %v794_v26 = vmul.f32 %v1503_v53, %v1899_v30  ;;  %v875_v12 = vadd.f32 %v1911_v36, %v839_v57  ;;  %1524 = vpow2.f32 %v2212_v54  ;;  %v821_v10 = vadd.f32 %v1909_v35, %v785_v60  ;;  %p1616_p13 = pnand %p1615_p7, %p2542_p9  ;;  %p1622_p4 = scmp.lt.s32.totalorder %s1620_s14, %s1614_s28 }
 0x14c   : > { %v1507_v6 = vpop.eup %1506  ;;  %v793_v56 = vmul.f32 %v1505_v51, %v1899_v30  ;;  %v828_v11 = vadd.f32 %v1907_v34, %v792_v13  ;;  %1526 = vpow2.f32 %v2214_v29  ;;  %v822_v16 = vadd.f32 %v1909_v35, %v786_v4 }
 0x14d   : > { %v1509_v62 = vpop.eup %1508  ;;  %v795_v21 = vmul.f32 %v1507_v6, %v1899_v30  ;;  %v830_v0 = vadd.f32 %v1907_v34, %v794_v26  ;;  %1528 = vpow2.f32 %v1351_v61  ;;  %v823_v57 = vadd.f32 %v1909_v35, %v787_v49  ;;  %p1617_p3 = pneg %p1616_p13  ;;  %p1623_p10 = por %p1622_p4, %p1621_p6 }
 0x14e   : > { %v1511_v54 = vpop.eup %1510  ;;  %v829_v60 = vadd.f32 %v1907_v34, %v793_v56  ;;  %v687_v45 = vadd.f32 1.0, %v1509_v62  ;;  %v852_v46 = vmul.f32 %v1501_v55, %v828_v11  ;;  %1530 = vpow2.f32 %v1353_v48 }
 0x14f   : > { %v1513_v47 = vpop.eup %1512  ;;  %v831_v13 = vadd.f32 %v1907_v34, %v795_v21  ;;  %v689_v29 = vadd.f32 1.0, %v1511_v54  ;;  %v854_v42 = vmul.f32 %v1503_v53, %v830_v0  ;;  %v973_v4 = vadd.f32 %v2011_v44, %v872_v50  ;;  %p1624_p12 = pnand %p1623_p10, %p1617_p3 }
 0x150   : > { %v1515_v36 = vpop.eup %1514  ;;  %1532 = vrcp.f32 %v687_v45  ;;  %v688_v30 = vadd.f32 1.0, %v1513_v47  ;;  %v853_v26 = vmul.f32 %v1505_v51, %v829_v60  ;;  %v2292_v61 = vadd.f32 %v1915_v40, %v852_v46 }
 0x151   : > { %v1517_v49 = vpop.eup %1516  ;;  %1534 = vrcp.f32 %v689_v29  ;;  %v690_v56 = vadd.f32 1.0, %v1515_v36  ;;  %v855_v62 = vmul.f32 %v1507_v6, %v831_v13  ;;  %v2295_v11 = vadd.f32 %v1915_v40, %v854_v42 }
 0x152   : > { %v1519_v48 = vpop.eup %1518  ;;  %1536 = vrcp.f32 %v688_v30  ;;  %v695_v55 = vadd.f32 1.0, %v1517_v49  ;;  %v2298_v0 = vadd.f32 %v1915_v40, %v853_v26  ;;  %v974_v44 = vadd.f32 %v2032_v23, %v873_v59 }
 0x153   : > { %v1521_v45 = vpop.eup %1520  ;;  %1538 = vrcp.f32 %v690_v56  ;;  %v697_v47 = vadd.f32 1.0, %v1519_v48  ;;  %v2302_v46 = vadd.f32 %v1915_v40, %v855_v62  ;;  %v975_v36 = vadd.f32 %v2036_v25, %v874_v5 }
 0x154   : > { %v1523_v50 = vpop.eup %1522  ;;  %1540 = vrcp.f32 %v695_v55  ;;  %v696_v42 = vadd.f32 1.0, %v1521_v45  ;;  %v976_v53 = vadd.f32 %v2042_v41, %v875_v12  ;;  %v844_v30 = vmul.f32 %v2247_v31, %v820_v27 }
 0x155   : > { %v1525_v51 = vpop.eup %1524  ;;  %1542 = vrcp.f32 %v697_v47  ;;  %v698_v6 = vadd.f32 1.0, %v1523_v50  ;;  %v845_v23 = vmul.f32 %v2258_v1, %v821_v10  ;;  %v846_v59 = vmul.f32 %v2252_v17, %v822_v16 }
 0x156   : > { %v1527_v21 = vpop.eup %1526  ;;  %1544 = vrcp.f32 %v696_v42  ;;  %v703_v54 = vadd.f32 1.0, %v1525_v51  ;;  %v847_v60 = vmul.f32 %v2264_v52, %v823_v57  ;;  %v880_v25 = vadd.f32 %v1913_v38, %v844_v30  ;;  %v2543_v30 = vld [vmem:[#allocation12_spill] sm:$0xff] }
 0x157   : > { %v1529_v5 = vpop.eup %1528  ;;  %1546 = vrcp.f32 %v698_v6  ;;  %v705_v41 = vadd.f32 1.0, %v1527_v21  ;;  %v881_v31 = vadd.f32 %v1913_v38, %v845_v23  ;;  %v882_v27 = vadd.f32 %v1913_v38, %v846_v59 }
 0x158   : > { %v1531_v12 = vpop.eup %1530  ;;  %1548 = vrcp.f32 %v703_v54  ;;  %v704_v1 = vadd.f32 1.0, %v1529_v5  ;;  %v883_v17 = vadd.f32 %v1913_v38, %v847_v60  ;;  %v1074_v10 = vadd.f32 %v2101_v37, %v973_v4  ;;  %v2544_v60 = vld [vmem:[#allocation11_spill] sm:$0xff] }
 0x159   : > { %1550 = vrcp.f32 %v705_v41  ;;  %v706_v16 = vadd.f32 1.0, %v1531_v12  ;;  %v1075_v52 = vadd.f32 %v2104_v58, %v974_v44  ;;  %v1076_v57 = vadd.f32 %v2107_v43, %v975_v36  ;;  %v2545_v41 = vld [vmem:[#allocation21_spill] sm:$0xff] }
 0x15a   : > { %v1533_v13 = vpop.eup %1532  ;;  %1552 = vrcp.f32 %v704_v1  ;;  %v1077_v29 = vadd.f32 %v2112_v63, %v976_v53  ;;  %1098 = vst [vmem:[%s2320_s17] sm:$0xff] %v1074_v10  ;;  %v981_v37 = vadd.f32 %v1953_v3, %v880_v25  ;;  %v982_v4 = vadd.f32 %v1962_v7, %v881_v31 }
 0x15b   : > { %v1535_v26 = vpop.eup %1534  ;;  %v780_v58 = vmul.f32 %v1533_v13, %v1895_v28  ;;  %1554 = vrcp.f32 %v706_v16  ;;  %1099 = vst [vmem:[%s2320_s17 + $0x8] sm:$0xff] %v1075_v52  ;;  %1100 = vst [vmem:[%s2320_s17 + $0x10] sm:$0xff] %v1076_v57  ;;  %v983_v43 = vadd.f32 %v1965_v8, %v882_v27  ;;  %v984_v63 = vadd.f32 %v1968_v9, %v883_v17 }
 0x15c   : > { %v1537_v49 = vpop.eup %1536  ;;  %v782_v56 = vmul.f32 %v1535_v26, %v1895_v28  ;;  %1101 = vst [vmem:[%s2320_s17 + $0x18] sm:$0xff] %v1077_v29  ;;  %v1082_v3 = vadd.f32 %v1985_v15, %v981_v37  ;;  %v1083_v7 = vadd.f32 %v1988_v18, %v982_v4  ;;  %v989_v62 = vadd.f32 %v2062_v2, %v2292_v61 }
 0x15d   : > { %v1539_v48 = vpop.eup %1538  ;;  %v816_v55 = vadd.f32 %v1903_v32, %v780_v58  ;;  %v781_v8 = vmul.f32 %v1537_v49, %v1895_v28  ;;  %v1084_v9 = vadd.f32 %v1991_v19, %v983_v43  ;;  %v1085_v44 = vadd.f32 %v1994_v20, %v984_v63  ;;  %v2548_v58 = vld [vmem:[#allocation24_spill] sm:$0xff] }
 0x15e   : > { %v1541_v45 = vpop.eup %1540  ;;  %v818_v47 = vadd.f32 %v1903_v32, %v782_v56  ;;  %v783_v15 = vmul.f32 %v1539_v48, %v1895_v28  ;;  %1106 = vst [vmem:[%s2320_s17 + $0x40] sm:$0xff] %v1082_v3  ;;  %1107 = vst [vmem:[%s2320_s17 + $0x48] sm:$0xff] %v1083_v7  ;;  %v2346_v18 = vadd.f32 %v2068_v24, %v2298_v0 }
 0x15f   : > { %v2350_v2 = vadd.f32 %v2074_v22, %v2295_v11  ;;  %v1543_v61 = vpop.eup %1542  ;;  %v840_v36 = vmul.f32 %v1533_v13, %v816_v55  ;;  %v817_v19 = vadd.f32 %v1903_v32, %v781_v8  ;;  %v788_v20 = vmul.f32 %v1541_v45, %v1905_v33  ;;  %1108 = vst [vmem:[%s2320_s17 + $0x50] sm:$0xff] %v1084_v9  ;;  %v2547_v13 = vld [vmem:[#allocation22_spill] sm:$0xff] }
 0x160   : > { %1109 = vst [vmem:[%s2320_s17 + $0x58] sm:$0xff] %v1085_v44  ;;  %v2358_v28 = vadd.f32 %v2080_v39, %v2302_v46  ;;  %v1545_v50 = vpop.eup %1544  ;;  %v842_v24 = vmul.f32 %v1535_v26, %v818_v47  ;;  %v819_v0 = vadd.f32 %v1903_v32, %v783_v15  ;;  %v790_v22 = vmul.f32 %v1543_v61, %v1905_v33 }
 0x161   : > { %v1090_v11 = vadd.f32 %v2130_v14, %v989_v62  ;;  %v1547_v42 = vpop.eup %1546  ;;  %v841_v53 = vmul.f32 %v1537_v49, %v817_v19  ;;  %v876_v51 = vadd.f32 %v2543_v30, %v840_v36  ;;  %v789_v6 = vmul.f32 %v1545_v50, %v1905_v33  ;;  %v2550_v36 = vld [vmem:[#allocation30_spill] sm:$0xff] }
 0x162   : > { %v824_v23 = vadd.f32 %v1909_v35, %v788_v20  ;;  %v1549_v59 = vpop.eup %1548  ;;  %v843_v39 = vmul.f32 %v1539_v48, %v819_v0  ;;  %v878_v46 = vadd.f32 %v2543_v30, %v842_v24  ;;  %v791_v21 = vmul.f32 %v1547_v42, %v1905_v33  ;;  %v2546_v33 = vld [vmem:[#allocation23_spill] sm:$0xff]  ;;  %v2552_v0 = vld [vmem:[#allocation32_spill] sm:$0xff] }
 0x163   : > { %v826_v32 = vadd.f32 %v1909_v35, %v790_v22  ;;  %1114 = vst [vmem:[%s2320_s17 + $0x80] sm:$0xff] %v1090_v11  ;;  %v1551_v54 = vpop.eup %1550  ;;  %v877_v14 = vadd.f32 %v2543_v30, %v841_v53  ;;  %v796_v25 = vmul.f32 %v1549_v59, %v2544_v60  ;;  %v825_v5 = vadd.f32 %v1909_v35, %v789_v6  ;;  %v2553_v11 = vld [vmem:[#allocation13_spill] sm:$0xff] }
 0x164   : > { %v977_v31 = vadd.f32 %v2545_v41, %v876_v51  ;;  %v1553_v27 = vpop.eup %1552  ;;  %v879_v12 = vadd.f32 %v2543_v30, %v843_v39  ;;  %v798_v1 = vmul.f32 %v1551_v54, %v2544_v60  ;;  %v827_v17 = vadd.f32 %v1909_v35, %v791_v21  ;;  %v2555_v51 = vld [vmem:[#allocation15_spill] sm:$0xff]  ;;  %v2557_v39 = vld [vmem:[#allocation17_spill] sm:$0xff] }
 0x165   : > { %v979_v10 = vadd.f32 %v2546_v33, %v878_v46  ;;  %v1555_v16 = vpop.eup %1554  ;;  %v832_v52 = vadd.f32 %v1907_v34, %v796_v25  ;;  %v797_v57 = vmul.f32 %v1553_v27, %v2544_v60  ;;  %v978_v29 = vadd.f32 %v2547_v13, %v877_v14  ;;  %v2558_v21 = vld [vmem:[#allocation25_spill] sm:$0xff]  ;;  %v2560_v14 = vld [vmem:[#allocation27_spill] sm:$0xff]  ;;  %v2561_v25 = vld [vmem:[#allocation18_spill] sm:$0xff] }
 0x166   : > { %v848_v37 = vmul.f32 %v1541_v45, %v824_v23  ;;  %v834_v4 = vadd.f32 %v1907_v34, %v798_v1  ;;  %v799_v26 = vmul.f32 %v1555_v16, %v2544_v60  ;;  %v980_v43 = vadd.f32 %v2548_v58, %v879_v12  ;;  %v2556_v23 = vld [vmem:[#allocation16_spill] sm:$0xff]  ;;  %v2562_v41 = vld [vmem:[#allocation19_spill] sm:$0xff]  ;;  %v2565_v33 = vld [vmem:[#allocation33_spill] sm:$0xff] }
 0x167   : > { %v849_v63 = vmul.f32 %v1545_v50, %v825_v5  ;;  %v856_v49 = vmul.f32 %v1549_v59, %v832_v52  ;;  %v833_v35 = vadd.f32 %v1907_v34, %v797_v57  ;;  %v850_v56 = vmul.f32 %v1543_v61, %v826_v32  ;;  %v2549_v61 = vld [vmem:[#allocation29_spill] sm:$0xff]  ;;  %v2551_v50 = vld [vmem:[#allocation31_spill] sm:$0xff]  ;;  %v2564_v1 = vld [vmem:[#allocation28_spill] sm:$0xff] }
 0x168   : > { %v851_v3 = vmul.f32 %v1547_v42, %v827_v17  ;;  %v858_v7 = vmul.f32 %v1551_v54, %v834_v4  ;;  %v835_v62 = vadd.f32 %v1907_v34, %v799_v26  ;;  %v884_v48 = vadd.f32 %v1913_v38, %v848_v37  ;;  %v2559_v54 = vld [vmem:[#allocation26_spill] sm:$0xff]  ;;  %v2567_v57 = vld [vmem:[#allocation35_spill] sm:$0xff]  ;;  %v2569_v4 = vld [vmem:[#allocation37_spill] sm:$0xff] }
 0x169   : > { %v885_v55 = vadd.f32 %v1913_v38, %v849_v63  ;;  %v892_v8 = vadd.f32 %v1915_v40, %v856_v49  ;;  %v857_v9 = vmul.f32 %v1553_v27, %v833_v35  ;;  %v886_v44 = vadd.f32 %v1913_v38, %v850_v56  ;;  %v2563_v27 = vld [vmem:[#allocation20_spill] sm:$0xff]  ;;  %v2570_v58 = vld [vmem:[#allocation38_spill] sm:$0xff] }
 0x16a   : > { %v887_v45 = vadd.f32 %v1913_v38, %v851_v3  ;;  %v894_v47 = vadd.f32 %v1915_v40, %v858_v7  ;;  %v859_v15 = vmul.f32 %v1555_v16, %v835_v62  ;;  %v1078_v34 = vadd.f32 %v2549_v61, %v977_v31  ;;  %v2554_v38 = vld [vmem:[#allocation14_spill] sm:$0xff] }
 0x16b   : > { %v1079_v19 = vadd.f32 %v2550_v36, %v978_v29  ;;  %v893_v20 = vadd.f32 %v1915_v40, %v857_v9  ;;  %v1080_v24 = vadd.f32 %v2551_v50, %v979_v10  ;;  %v1081_v22 = vadd.f32 %v2552_v0, %v980_v43  ;;  %v2566_v16 = vld [vmem:[#allocation34_spill] sm:$0xff]  ;;  %v2568_v29 = vld [vmem:[#allocation36_spill] sm:$0xff]  ;;  %v2571_v43 = vld [vmem:[#allocation39_spill] sm:$0xff] }
 0x16c   : > { %v985_v42 = vadd.f32 %v2553_v11, %v884_v48  ;;  %v895_v53 = vadd.f32 %v1915_v40, %v859_v15  ;;  %1102 = vst [vmem:[%s2320_s17 + $0x20] sm:$0xff] %v1078_v34  ;;  %v986_v30 = vadd.f32 %v2554_v38, %v885_v55  ;;  %v987_v6 = vadd.f32 %v2555_v51, %v886_v44 }
 0x16d   : > { %1103 = vst [vmem:[%s2320_s17 + $0x28] sm:$0xff] %v1079_v19  ;;  %v988_v59 = vadd.f32 %v2556_v23, %v887_v45  ;;  %1104 = vst [vmem:[%s2320_s17 + $0x30] sm:$0xff] %v1080_v24  ;;  %v993_v32 = vadd.f32 %v2558_v21, %v892_v8  ;;  %v994_v40 = vadd.f32 %v2559_v54, %v893_v20 }
 0x16e   : > { %1105 = vst [vmem:[%s2320_s17 + $0x38] sm:$0xff] %v1081_v22  ;;  %v1086_v46 = vadd.f32 %v2557_v39, %v985_v42  ;;  %v995_v60 = vadd.f32 %v2560_v14, %v894_v47  ;;  %v1087_v5 = vadd.f32 %v2561_v25, %v986_v30  ;;  %v1088_v31 = vadd.f32 %v2562_v41, %v987_v6 }
 0x16f   : > { %v1089_v12 = vadd.f32 %v2563_v27, %v988_v59  ;;  %v996_v17 = vadd.f32 %v2564_v1, %v895_v53  ;;  %v1091_v10 = vadd.f32 %v2565_v33, %v2346_v18  ;;  %v1092_v52 = vadd.f32 %v2566_v16, %v2350_v2 }
 0x170   : > { %1110 = vst [vmem:[%s2320_s17 + $0x60] sm:$0xff] %v1086_v46  ;;  %v1093_v13 = vadd.f32 %v2567_v57, %v2358_v28  ;;  %v1094_v37 = vadd.f32 %v2568_v29, %v993_v32  ;;  %1111 = vst [vmem:[%s2320_s17 + $0x68] sm:$0xff] %v1087_v5  ;;  %v1095_v26 = vadd.f32 %v2569_v4, %v994_v40 }
 0x171   : > { %1112 = vst [vmem:[%s2320_s17 + $0x70] sm:$0xff] %v1088_v31  ;;  %1113 = vst [vmem:[%s2320_s17 + $0x78] sm:$0xff] %v1089_v12  ;;  %v1096_v18 = vadd.f32 %v2570_v58, %v995_v60  ;;  %v1097_v63 = vadd.f32 %v2571_v43, %v996_v17 }
 0x172   : > { %1115 = vst [vmem:[%s2320_s17 + $0x88] sm:$0xff] %v1091_v10  ;;  %1116 = vst [vmem:[%s2320_s17 + $0x90] sm:$0xff] %v1092_v52 }
 0x173   : > { %1117 = vst [vmem:[%s2320_s17 + $0x98] sm:$0xff] %v1093_v13  ;;  %1118 = vst [vmem:[%s2320_s17 + $0xa0] sm:$0xff] %v1094_v37 }
 0x174   : > { %1119 = vst [vmem:[%s2320_s17 + $0xa8] sm:$0xff] %v1095_v26  ;;  %1120 = vst [vmem:[%s2320_s17 + $0xb0] sm:$0xff] %v1096_v18 }
 0x175   : > { %1121 = vst [vmem:[%s2320_s17 + $0xb8] sm:$0xff] %v1097_v63 }
 0x176   : > { %1627 = shalt.err (!%p1624_p12)
}
 0x177   : > { %s1628_s24 = scalar_lea.hbm %s2434_s27, 3072  ;;  %s1632_s17 = scalar_lea.hbm %s2500_s5, 6144 }
 0x178   : > { %p1629_p1 = scmp.ne.s32.totalorder %s2434_s27, %s1628_s24  ;;  %p1633_p8 = scmp.lt.u32.totalorder %s2434_s27, %s2500_s5 }
 0x179   : > { %p1634_p11 = scmp.lt.u32.totalorder %s1632_s17, %s1628_s24  ;;  %p1636_p7 = scmp.lt.u32.totalorder %s1628_s24, %s2434_s27 }
 0x17a   : > { %p1630_p2 = pnand %p1629_p1, %p2542_p9 }
 0x17b   : > { %p1635_p0 = por %p1634_p11, %p1633_p8 }
 0x17c   : > { %p1631_p5 = pneg %p1630_p2 }
 0x17d   : > { %p1637_p13 = por %p1636_p7, %p1635_p0 }
 0x17f   : > { %p1638_p3 = pnand %p1637_p13, %p1631_p5 }
 0x181   : > { %1641 = shalt.err (!%p1638_p3)
}
 0x182   : > { %1366 = dma.vmem_to_hbm [thread:$0]  (%p2542_p9), %s2436_s30, 3072, %s2434_s27, %s1128_s29, %s1710_s12, %s1710_s12, %s1711_s15  }
 0x183 PF: > { %s1176_s28 = sand.u32 1, %s1680_s18   ;;  %p2572_p6 = scmp.ne.s32.totalorder %s2509_s8, 0 }
 0x184   : > { %p2573_p4 = scmp.ge.s32.totalorder %s1700_s23, 2  ;;  %s1177_s21 = scalar_lea.sflag [#allocation4], %s1176_s28 }
 0x186   : > { %p1374_p10 = pnand %p2573_p4, %p2572_p6 }
 0x188   : > { %1671 = dma.done.wait (!%p1374_p10), %s1177_s21, 3072  }
 0x189   : > { %1673 = vsyncadd (!%p1374_p10), %s1177_s21, 4294964224  ;;  %s1186_s6 = scalar_lea.sflag [#allocation7], %s1176_s28 }
 0x18a   : > { %1675 = dma.done.wait (!%p1374_p10), %s1186_s6, 3072  }
 0x18b   : > { %1677 = vsyncadd (!%p1374_p10), %s1186_s6, 4294964224  ;;  %s25_s23 = sadd.s32 1, %s1700_s23   ;;  %s2574_s18 = smov %s1684_s19 }
 0x18c   : > { %p22_p12 = scmp.ge.s32.totalorder %s25_s23, 4   ;;  %s2575_s19 = smov %s1688_s20 }
 0x18d   : > { %s2576_s20 = smov %s1799_s7  ;;  %s2577_s21 = smov %s1696_s22 }
 0x18e   : > { %s2578_s22 = smov %s2580_s26  ;;  %24 = sbr.rel (!%p22_p12) target bundleno = 8 (0x8), region = 102 }
 0x195   :  { %1191 = vsyncpa [#allocation3], 1 }
 0x196   :  { %1193 = vsyncpa [#allocation3 + $0x1], 1 }
 0x197   :  { %1194 = vsyncpa [#allocation4], 1 }
 0x198   :  { %1196 = vsyncpa [#allocation4 + $0x1], 1 }
 0x199   :  { %1197 = vsyncpa [#allocation7], 1 }
 0x19a   :  { %1199 = vsyncpa [#allocation7 + $0x1], 1 }

</bundles_post_ra>
